<compile_context>
chip_gen: v7x
topology: tpu7x:2x2x1
jax: 0.10.0
libtpu: 0.0.40
codegen_flags: <defaults>
</compile_context>

<pallas_src>
import jax
import jax.numpy as jnp
from jax.experimental import pallas as pl
from jax.experimental.pallas import tpu as pltpu

_MIB = 1024 * 1024


def _round_up(v, m):
    return -(-v // m) * m


def _wavg_kernel(x_ref, w_ref, o_ref):
    # x_ref: (N, TB, TD) native-dtype feature tile
    # w_ref: (N, TB, 1)  f32 weights (pre-normalized in the wrapper if tonorm)
    # o_ref: (TB, TD)    output tile (any float dtype; accumulate in f32)
    n_items = x_ref.shape[0]
    acc = x_ref[0].astype(jnp.float32) * w_ref[0]
    for n in range(1, n_items):          # N is tiny & static: explicit MAC chain
        acc = acc + x_ref[n].astype(jnp.float32) * w_ref[n]
    o_ref[...] = acc.astype(o_ref.dtype)


def _tpu_vmem_and_cores():
    """(VMEM capacity bytes, TensorCores-per-chip guess). Conservative fallback."""
    vmem = 64 * _MIB
    try:
        info = pltpu.get_tpu_info()
        vmem = int(getattr(info, "vmem_capacity_bytes", vmem))
    except Exception:
        pass
    # Heuristic: 64 MiB-per-core parts (v7x) have 2 TCs; 128 MiB parts have 1.
    cores = 2 if vmem <= 64 * _MIB else 1
    return vmem, cores


def _tile_usage_bytes(N, tb, td, x_itemsize, out_itemsize):
    """Per-step VMEM bytes: double-buffered x/w/out tiles + f32 temporaries."""
    tb_pad = _round_up(tb, 8)
    x_b = 2 * N * tb_pad * td * x_itemsize        # x tile, double-buffered
    w_b = 2 * N * tb_pad * 128 * 4                # (N, tb, 1): lane pads 1 -> 128
    o_b = 2 * tb_pad * td * out_itemsize          # output tile, double-buffered
    t_b = 2 * tb_pad * td * 4                     # f32 accumulator + cast slab
    return x_b + w_b + o_b + t_b


def _pick_tiles(N, B, D, x_itemsize, out_itemsize, vmem_budget, two_cores):
    """Pick (tb, td, usage_bytes) for the 2-D (B, D) grid."""
    if D % 128 == 0:
        d_tiles = [t for t in range(128, D + 1, 128) if D % t == 0]
    else:
        d_tiles = [D]                             # full-D block is layout-legal
    if B % 8 == 0:
        b_tiles = [t for t in range(8, B + 1, 8) if B % t == 0]
    else:
        b_tiles = [B]                             # full-B block is layout-legal

    def usage(tb, td):
        return _tile_usage_bytes(N, tb, td, x_itemsize, out_itemsize)

    cands = [(tb, td) for tb in b_tiles for td in d_tiles]
    fitting = [c for c in cands if usage(*c) <= vmem_budget]
    min_lane = min(512, D)

    if fitting:
        def score(c):
            tb, td = c
            n_steps = (B // tb) * (D // td)
            lane_ok = td >= min_lane              # wide lane tiles ~ HBM roofline
            even_ok = (not two_cores) or (n_steps >= 2 and n_steps % 2 == 0)
            return (lane_ok, even_ok, -n_steps, td, tb)
        tb, td = max(fitting, key=score)
    else:                                         # nothing fits: minimize usage
        tb, td = min(cands, key=lambda c: usage(*c))
    return tb, td, usage(tb, td)


def weight_average(x, w, *, tonorm=True, out_dtype=jnp.float32):
    """Pallas implementation of WieghtAverage.forward(x, w).

    x: (N, B, D) any float dtype (kept native in HBM; cast to f32 in-kernel)
    w: (N, B)    any float dtype (cast to f32, matching .float() in torch)
    returns: (B, D) out_dtype (default f32, matching the PyTorch module)
    """
    N, B, D = x.shape
    assert w.shape == (N, B)
    out_dtype = jnp.dtype(out_dtype)

    # Tiny (N, B) preprocessing in plain JAX: cast + optional normalization.
    w32 = w.astype(jnp.float32)
    if tonorm:
        # Division by zero when sum_n w[:, b] == 0 matches the PyTorch reference.
        w32 = w32 / jnp.sum(w32, axis=0, keepdims=True)
    w3 = w32.reshape(N, B, 1)

    x_itemsize = jnp.dtype(x.dtype).itemsize
    out_itemsize = out_dtype.itemsize

    vmem_capacity, n_cores = _tpu_vmem_and_cores()
    # ~16 MiB budget on 64 MiB (v7x) parts, ~32 MiB on 128 MiB (v5e/v6e) parts.
    vmem_budget = min(32 * _MIB, vmem_capacity // 4)
    two_cores = n_cores >= 2

    d_work, x_work = D, x
    tb, td, usage = _pick_tiles(N, B, d_work, x_itemsize, out_itemsize,
                                vmem_budget, two_cores)
    if d_work % 128 != 0 and usage > vmem_budget:
        # Ragged-D full block would blow VMEM: pad D to a lane multiple instead.
        d_work = _round_up(D, 128)
        x_work = jnp.pad(x, ((0, 0), (0, 0), (0, d_work - D)))
        tb, td, usage = _pick_tiles(N, B, d_work, x_itemsize, out_itemsize,
                                    vmem_budget, two_cores)

    grid = (B // tb, d_work // td)
    vmem_limit = int(min(usage + 8 * _MIB, vmem_capacity))

    cost = pl.CostEstimate(
        flops=2 * N * B * D,
        transcendentals=0,
        bytes_accessed=(N * B * D * x_itemsize + N * B * 4
                        + B * D * out_itemsize),
    )

    out = pl.pallas_call(
        _wavg_kernel,
        out_shape=jax.ShapeDtypeStruct((B, d_work), out_dtype),
        grid_spec=pltpu.PrefetchScalarGridSpec(
            num_scalar_prefetch=0,
            grid=grid,
            in_specs=[
                pl.BlockSpec((N, tb, td), lambda bi, di: (0, bi, di)),
                pl.BlockSpec((N, tb, 1), lambda bi, di: (0, bi, 0)),
            ],
            out_specs=pl.BlockSpec((tb, td), lambda bi, di: (bi, di)),
        ),
        compiler_params=pltpu.CompilerParams(
            dimension_semantics=("parallel", "parallel"),
            vmem_limit_bytes=vmem_limit,
        ),
        cost_estimate=cost,
    )(x_work, w3)

    if d_work != D:
        out = out[:, :D]
    return out


def _reference(x, w, tonorm=True):
    # Pure-JAX mirror of the PyTorch forward (for verification).
    wv = w.reshape(w.shape[0], w.shape[1], -1).astype(jnp.float32)
    y = x.astype(jnp.float32) * wv
    y = y.sum(axis=0)
    if tonorm:
        y = y / w.astype(jnp.float32).sum(axis=0)[:, None]
    return y


if __name__ == "__main__":
    key = jax.random.PRNGKey(0)
    kx, kw = jax.random.split(key)

    # Small shapes: N items to average, batch B, feature dim D.
    N, B, D = 4, 8, 256
    x = jax.random.normal(kx, (N, B, D), dtype=jnp.float32)
    # strictly positive weights so normalization is well-defined
    w = jax.random.uniform(kw, (N, B), dtype=jnp.float32, minval=0.1, maxval=1.0)

    # tonorm=True, f32 inputs
    out = jax.block_until_ready(weight_average(x, w, tonorm=True))
    ref = _reference(x, w, tonorm=True)
    assert out.shape == (B, D) and out.dtype == jnp.float32
    assert jnp.allclose(out, ref, atol=1e-5, rtol=1e-5), "mismatch (tonorm=True)"

    # tonorm=False path
    out_nn = jax.block_until_ready(weight_average(x, w, tonorm=False))
    ref_nn = _reference(x, w, tonorm=False)
    assert jnp.allclose(out_nn, ref_nn, atol=1e-5, rtol=1e-5), "mismatch (tonorm=False)"

    # bf16 features stay bf16 in HBM; the kernel accumulates in f32.
    x_bf = x.astype(jnp.bfloat16)
    out_bf = jax.block_until_ready(weight_average(x_bf, w, tonorm=True))
    ref_bf = _reference(x_bf.astype(jnp.float32), w, tonorm=True)
    assert jnp.allclose(out_bf, ref_bf, atol=2e-2, rtol=2e-2), "mismatch (bf16 in)"

    # Optional narrow output (cuts output HBM traffic); accumulation stays f32.
    out_bo = jax.block_until_ready(
        weight_average(x_bf, w, tonorm=True, out_dtype=jnp.bfloat16))
    assert out_bo.dtype == jnp.bfloat16
    assert jnp.allclose(out_bo.astype(jnp.float32), ref_bf,
                        atol=5e-2, rtol=5e-2), "mismatch (bf16 out)"

    # Larger D exercises the multi-step / even-grid tiled path.
    D2 = 1024
    x2 = jax.random.normal(kx, (N, B, D2), dtype=jnp.float32)
    out2 = jax.block_until_ready(weight_average(x2, w, tonorm=True))
    ref2 = _reference(x2, w, tonorm=True)
    assert jnp.allclose(out2, ref2, atol=1e-5, rtol=1e-5), "mismatch (tiled D)"

    # Ragged D (not a multiple of 128): small, so stays a single full-D block.
    D3 = 200
    x3 = jax.random.normal(kx, (N, B, D3), dtype=jnp.float32)
    out3 = jax.block_until_ready(weight_average(x3, w, tonorm=True))
    ref3 = _reference(x3, w, tonorm=True)
    assert out3.shape == (B, D3)
    assert jnp.allclose(out3, ref3, atol=1e-5, rtol=1e-5), "mismatch (ragged D)"

    print("KERNEL_OK")
</pallas_src>

<mosaic_0001>
module attributes {stable_mosaic.version = 11 : i64} {
  func.func @_wavg_kernel(%arg0: i32, %arg1: i32, %arg2: memref<4x8x256xf32, #tpu.memory_space<vmem>>, %arg3: memref<4x8x1xf32, #tpu.memory_space<vmem>>, %arg4: memref<8x256xf32, #tpu.memory_space<vmem>>) attributes {dimension_semantics = [#tpu.dimension_semantics<parallel>, #tpu.dimension_semantics<parallel>], iteration_bounds = array<i64: 1, 1>, scalar_prefetch = 0 : i64, scratch_operands = 0 : i64, tpu.core_type = #tpu.core_type<tc>, window_params = [{transform_indices = @transform_0, window_bounds = array<i64: 4, 8, 256>}, {transform_indices = @transform_1, window_bounds = array<i64: 4, 8, 1>}, {transform_indices = @transform_2, window_bounds = array<i64: 8, 256>}]} {
    %c0 = arith.constant 0 : index
    %c0_0 = arith.constant 0 : index
    %c0_1 = arith.constant 0 : index
    %0 = vector.load %arg2[%c0, %c0_0, %c0_1] : memref<4x8x256xf32, #tpu.memory_space<vmem>>, vector<1x8x256xf32>
    %1 = vector.shape_cast %0 : vector<1x8x256xf32> to vector<8x256xf32>
    %c0_2 = arith.constant 0 : index
    %c0_3 = arith.constant 0 : index
    %c0_4 = arith.constant 0 : index
    %2 = vector.load %arg3[%c0_2, %c0_3, %c0_4] : memref<4x8x1xf32, #tpu.memory_space<vmem>>, vector<1x8x1xf32>
    %3 = vector.shape_cast %2 : vector<1x8x1xf32> to vector<8x1xf32>
    %4 = vector.broadcast %3 : vector<8x1xf32> to vector<8x256xf32>
    %5 = arith.mulf %1, %4 : vector<8x256xf32>
    %c1 = arith.constant 1 : index
    %c0_5 = arith.constant 0 : index
    %c0_6 = arith.constant 0 : index
    %6 = vector.load %arg2[%c1, %c0_5, %c0_6] : memref<4x8x256xf32, #tpu.memory_space<vmem>>, vector<1x8x256xf32>
    %7 = vector.shape_cast %6 : vector<1x8x256xf32> to vector<8x256xf32>
    %c1_7 = arith.constant 1 : index
    %c0_8 = arith.constant 0 : index
    %c0_9 = arith.constant 0 : index
    %8 = vector.load %arg3[%c1_7, %c0_8, %c0_9] : memref<4x8x1xf32, #tpu.memory_space<vmem>>, vector<1x8x1xf32>
    %9 = vector.shape_cast %8 : vector<1x8x1xf32> to vector<8x1xf32>
    %10 = vector.broadcast %9 : vector<8x1xf32> to vector<8x256xf32>
    %11 = arith.mulf %7, %10 : vector<8x256xf32>
    %12 = arith.addf %5, %11 : vector<8x256xf32>
    %c2 = arith.constant 2 : index
    %c0_10 = arith.constant 0 : index
    %c0_11 = arith.constant 0 : index
    %13 = vector.load %arg2[%c2, %c0_10, %c0_11] : memref<4x8x256xf32, #tpu.memory_space<vmem>>, vector<1x8x256xf32>
    %14 = vector.shape_cast %13 : vector<1x8x256xf32> to vector<8x256xf32>
    %c2_12 = arith.constant 2 : index
    %c0_13 = arith.constant 0 : index
    %c0_14 = arith.constant 0 : index
    %15 = vector.load %arg3[%c2_12, %c0_13, %c0_14] : memref<4x8x1xf32, #tpu.memory_space<vmem>>, vector<1x8x1xf32>
    %16 = vector.shape_cast %15 : vector<1x8x1xf32> to vector<8x1xf32>
    %17 = vector.broadcast %16 : vector<8x1xf32> to vector<8x256xf32>
    %18 = arith.mulf %14, %17 : vector<8x256xf32>
    %19 = arith.addf %12, %18 : vector<8x256xf32>
    %c3 = arith.constant 3 : index
    %c0_15 = arith.constant 0 : index
    %c0_16 = arith.constant 0 : index
    %20 = vector.load %arg2[%c3, %c0_15, %c0_16] : memref<4x8x256xf32, #tpu.memory_space<vmem>>, vector<1x8x256xf32>
    %21 = vector.shape_cast %20 : vector<1x8x256xf32> to vector<8x256xf32>
    %c3_17 = arith.constant 3 : index
    %c0_18 = arith.constant 0 : index
    %c0_19 = arith.constant 0 : index
    %22 = vector.load %arg3[%c3_17, %c0_18, %c0_19] : memref<4x8x1xf32, #tpu.memory_space<vmem>>, vector<1x8x1xf32>
    %23 = vector.shape_cast %22 : vector<1x8x1xf32> to vector<8x1xf32>
    %24 = vector.broadcast %23 : vector<8x1xf32> to vector<8x256xf32>
    %25 = arith.mulf %21, %24 : vector<8x256xf32>
    %26 = arith.addf %19, %25 : vector<8x256xf32>
    %c0_20 = arith.constant 0 : index
    %c0_21 = arith.constant 0 : index
    %27 = vector.load %arg4[%c0_20, %c0_21] : memref<8x256xf32, #tpu.memory_space<vmem>>, vector<8x256xf32>
    tpu.vector_store %arg4[%c0_20, %c0_21], %26 {strides = array<i32>} : memref<8x256xf32, #tpu.memory_space<vmem>>, vector<8x256xf32>,
    return
  }
  func.func @transform_0(%arg0: i32, %arg1: i32) -> (i32, i32, i32) {
    %c0_i32 = arith.constant 0 : i32
    %c0_i32_0 = arith.constant 0 : i32
    return %c0_i32, %arg0, %arg1 : i32, i32, i32
  }
  func.func @transform_1(%arg0: i32, %arg1: i32) -> (i32, i32, i32) {
    %c0_i32 = arith.constant 0 : i32
    %c0_i32_0 = arith.constant 0 : i32
    %c0_i32_1 = arith.constant 0 : i32
    return %c0_i32, %arg0, %c0_i32_0 : i32, i32, i32
  }
  func.func @transform_2(%arg0: i32, %arg1: i32) -> (i32, i32) {
    %c0_i32 = arith.constant 0 : i32
    return %arg0, %arg1 : i32, i32
  }
}

</mosaic_0001>

<bundles_post_ra>
// kernel: tpu_custom_call.1
= control target key start
LH: loop header
LB: loop body
LE: loop exit
PB: predicated region body
PF: predicated region fallthrough
CT: control target
= control target key end

     0   :  { %7 = vsyncpa [#allocation3], 0  ;;  %s209_s0 = inlined_call_operand.hbm [shape: f32[4,8,256], index: 0, kind: input, shape index: {}]   ;;  %s210_s1 = inlined_call_operand.vmem [shape: f32[4,8,1], index: 1, kind: input, shape index: {}]   ;;  %s211_s2 = inlined_call_operand.hbm [shape: f32[8,256], index: 2, kind: output, shape index: {}]  }
   0x1   :  { %8 = vsyncpa [#allocation4], 0  ;;  %s153_s9 = smov [#allocation2]   ;;  %s105_s13 = scalar_lea.hbm %s209_s0, 1024 }
   0x2   :  { %s14_s10 = sshll.u32 %s153_s9, 4  ;;  %p106_p0 = scmp.ne.s32.totalorder %s209_s0, %s105_s13  ;;  %s15_s10 = int_to_ptr.vmem [resolvable:$true] %s14_s10 }
   0x3   :  { %p109_p1 = scmp.lt.u32.totalorder %s105_s13, %s209_s0 }
   0x5   :  { %p111_p2 = pnand %p109_p1, %p106_p0 }
   0x7   :  { %114 = shalt.err (!%p111_p2)
}
   0x8   :  { %s115_s18 = scalar_lea.vmem %s15_s10, 1024  ;;  %p120_p4 = scmp.lt.s32.totalorder %s15_s10, %s15_s10 }
   0x9   :  { %p116_p3 = scmp.ne.s32.totalorder %s15_s10, %s115_s18  ;;  %p121_p5 = scmp.lt.s32.totalorder %s115_s18, %s115_s18 }
   0xb   :  { %p122_p6 = por %p121_p5, %p120_p4 }
   0xd   :  { %p123_p7 = pnand %p122_p6, %p116_p3 }
   0xf   :  { %126 = shalt.err (!%p123_p7)
}
  0x10   :  { %s154_s19 = smov 256   ;;  %s155_s20 = smov 16  }
  0x11   :  { %20 = dma.hbm_to_vmem [thread:$0]  %s209_s0, 1024, %s15_s10, [#allocation3], %s154_s19, %s154_s19, %s155_s20  }
  0x12   :  { %149 = dma.done.wait [#allocation3], 1024  }
  0x13   :  { %150 = vsyncadd [#allocation3], 4294966272  ;;  %v156_v0 = vmov 0   ;;  %v96_v1 = vld [vmem:[%s210_s1 + $0x10] sm:$0xff]  ;;  %v28_v2 = vld [vmem:[%s210_s1] sm:$0xff] }
  0x14   :  { %104 = vset.pattern.permute.xlu1 %v156_v0  ;;  %103 = vset.pattern.permute.xlu0 %v156_v0  ;;  %v97_v3 = vld [vmem:[%s210_s1 + $0x18] sm:$0xff]  ;;  %v95_v4 = vld [vmem:[%s210_s1 + $0x8] sm:$0xff]  ;;  %v26_v7 = vld [vmem:[#allocation2] sm:$0xff]  ;;  %s157_s1 = smov [#allocation5]  }
  0x15   :  { %57 = vperm.xlu1 %104, %v96_v1   ;;  %31 = vperm.xlu0 %103, %v28_v2   ;;  %v27_v8 = vld [vmem:[#allocation2 + $0x8] sm:$0xff]  ;;  %v37_v9 = vld [vmem:[#allocation2 + $0x10] sm:$0xff]  ;;  %v38_v10 = vld [vmem:[#allocation2 + $0x18] sm:$0xff]  ;;  %s86_s30 = sshll.u32 %s157_s1, 4  ;;  %s87_s30 = int_to_ptr.vmem [resolvable:$true] %s86_s30 }
  0x16   :  { %v51_v11 = vld [vmem:[#allocation2 + $0x20] sm:$0xff]  ;;  %v52_v12 = vld [vmem:[#allocation2 + $0x28] sm:$0xff]  ;;  %v65_v18 = vld [vmem:[#allocation2 + $0x30] sm:$0xff]  ;;  %s127_s3 = scalar_lea.vmem %s87_s30, 256  ;;  %p132_p9 = scmp.lt.s32.totalorder %s87_s30, %s87_s30 }
  0x17   :  { %v66_v19 = vld [vmem:[#allocation2 + $0x38] sm:$0xff]  ;;  %p128_p8 = scmp.ne.s32.totalorder %s87_s30, %s127_s3  ;;  %p133_p10 = scmp.lt.s32.totalorder %s127_s3, %s127_s3 }
  0x19   :  { %71 = vperm.xlu1 %104, %v97_v3   ;;  %43 = vperm.xlu0 %103, %v95_v4   ;;  %p134_p11 = por %p133_p10, %p132_p9 }
  0x1b   :  { %p135_p12 = pnand %p134_p11, %p128_p8 }
  0x94   :  { %v58_v5 = vpop.permute.xlu1 %57  ;;  %v32_v6 = vpop.permute.xlu0 %31 }
  0x95   :  { %v34_v14 = vmul.f32 %v32_v6, %v26_v7  ;;  %v35_v15 = vmul.f32 %v32_v6, %v27_v8  ;;  %v60_v21 = vmul.f32 %v58_v5, %v51_v11  ;;  %v61_v22 = vmul.f32 %v58_v5, %v52_v12 }
  0x98   :  { %v44_v13 = vpop.permute.xlu0 %43  ;;  %v72_v20 = vpop.permute.xlu1 %71 }
  0x99   :  { %v46_v16 = vmul.f32 %v44_v13, %v37_v9  ;;  %v47_v17 = vmul.f32 %v44_v13, %v38_v10  ;;  %v74_v25 = vmul.f32 %v72_v20, %v65_v18  ;;  %v75_v26 = vmul.f32 %v72_v20, %v66_v19 }
  0x9b   :  { %v48_v23 = vadd.f32 %v46_v16, %v34_v14  ;;  %v49_v24 = vadd.f32 %v47_v17, %v35_v15 }
  0x9d   :  { %v62_v27 = vadd.f32 %v60_v21, %v48_v23  ;;  %v63_v28 = vadd.f32 %v61_v22, %v49_v24 }
  0x9f   :  { %v76_v29 = vadd.f32 %v74_v25, %v62_v27  ;;  %v77_v30 = vadd.f32 %v75_v26, %v63_v28 }
  0xa1   :  { %78 = vst [vmem:[#allocation5] sm:$0xff] %v76_v29  ;;  %79 = vst [vmem:[#allocation5 + $0x8] sm:$0xff] %v77_v30 }
  0xa2   :  { %138 = shalt.err (!%p135_p12)
}
  0xa3   :  { %s139_s6 = scalar_lea.hbm %s211_s2, 256 }
  0xa4   :  { %p140_p13 = scmp.ne.s32.totalorder %s211_s2, %s139_s6  ;;  %p143_p0 = scmp.lt.u32.totalorder %s139_s6, %s211_s2 }
  0xa6   :  { %p145_p1 = pnand %p143_p0, %p140_p13 }
  0xa8   :  { %148 = shalt.err (!%p145_p1)
}
  0xa9   :  { %89 = dma.vmem_to_hbm [thread:$0]  %s87_s30, 256, %s211_s2, [#allocation4]  }
  0xaa   :  { %151 = dma.done.wait [#allocation4], 256  }
  0xab   :  { %152 = vsyncadd [#allocation4], 4294967040 }
  0xac   :  { %93 = vsyncpa [#allocation3], 1 }
  0xad   :  { %94 = vsyncpa [#allocation4], 1 }

</bundles_post_ra>
